<compile_context>
chip_gen: v7x
topology: tpu7x:2x2x1
jax: 0.10.0
libtpu: 0.0.40
codegen_flags: <defaults>
</compile_context>

<pallas_src>
from functools import partial

import jax
import jax.numpy as jnp
from jax.experimental import pallas as pl
from jax.experimental.pallas import tpu as pltpu

MIB = 1024 * 1024
LANES = 128

# ---------------------------------------------------------------------------
# Kernel: broadcasted elementwise multiply (mask already pre-scaled)
# ---------------------------------------------------------------------------
def _dropout_apply_kernel(x_ref, m_ref, y_ref):
    # x_ref: (tile_n, tile_d), m_ref: (1, tile_d) broadcast over sublanes
    y_ref[...] = x_ref[...] * m_ref[...]


# ---------------------------------------------------------------------------
# Generation-aware VMEM / block-size budget
# ---------------------------------------------------------------------------
_VMEM_CAP = None


def _vmem_capacity_bytes():
    global _VMEM_CAP
    if _VMEM_CAP is None:
        try:
            _VMEM_CAP = int(pltpu.get_tpu_info().vmem_capacity_bytes)
        except Exception:
            _VMEM_CAP = 64 * MIB  # conservative fallback (v7x-sized)
    return _VMEM_CAP


def _choose_tiles(n, d, itemsize):
    """Pick (tile_n, tile_d, vmem_limit_bytes) for a (n, d) array."""
    granule = {4: 8, 2: 16, 1: 32}.get(itemsize, 8)
    vmem_cap = _vmem_capacity_bytes()
    if vmem_cap <= 96 * MIB:
        # v7x-class: 64 MiB physical VMEM per TC, ~3.2 TB/s HBM -> bigger
        # blocks amortize the ~0.35 us per-grid-step overhead.
        target, vmem_limit = 6 * MIB, 40 * MIB
    else:
        # v5e / v6e: 128 MiB physical VMEM.
        target, vmem_limit = 4 * MIB, 64 * MIB

    if d > LANES and granule * d * itemsize > target:
        # Very wide feature dim: add a lane-tiling axis so blocks stay in the
        # budget (avoids VMEM blowups / degraded pipelining for huge D).
        tile_d = (target // (granule * itemsize) // LANES) * LANES
        tile_d = max(LANES, min(tile_d, d))
        tile_n = granule if n >= granule else n
    else:
        tile_d = d
        rows = max(granule, target // max(1, d * itemsize))
        rows = (rows // granule) * granule
        # Keep >= 2 row-tiles whenever possible so dimension_semantics
        # ("parallel",...) can shard across v7x's two TensorCores.
        half = (((n + 1) // 2) // granule) * granule
        if half >= granule:
            rows = min(rows, half)
        if rows >= n or n < granule:
            rows = n  # single full-extent block (always a legal block shape)
        tile_n = rows
    return tile_n, tile_d, vmem_limit


# ---------------------------------------------------------------------------
# pallas_call wrapper: y = x * mask_scaled  (mask_scaled_f32 has shape (D,))
# ---------------------------------------------------------------------------
def _apply(x2d, mask_scaled_f32):
    n, d = x2d.shape
    itemsize = jnp.dtype(x2d.dtype).itemsize

    # Pre-scaled mask computed in f32, cast to x.dtype exactly once (tiny).
    m = mask_scaled_f32.astype(x2d.dtype).reshape(1, d)

    # Lane-dense output: pad features to a multiple of 128 so stores are
    # full-width vst rather than masked partial stores.
    d_pad = ((d + LANES - 1) // LANES) * LANES
    if d_pad != d:
        x2d = jnp.pad(x2d, ((0, 0), (0, d_pad - d)))
        m = jnp.pad(m, ((0, 0), (0, d_pad - d)))

    tile_n, tile_d, vmem_limit = _choose_tiles(n, d_pad, itemsize)
    grid = (pl.cdiv(n, tile_n), pl.cdiv(d_pad, tile_d))

    y = pl.pallas_call(
        _dropout_apply_kernel,
        out_shape=jax.ShapeDtypeStruct((n, d_pad), x2d.dtype),
        grid=grid,
        in_specs=[
            pl.BlockSpec((tile_n, tile_d), lambda i, j: (i, j)),
            pl.BlockSpec((1, tile_d), lambda i, j: (0, j)),
        ],
        out_specs=pl.BlockSpec((tile_n, tile_d), lambda i, j: (i, j)),
        compiler_params=pltpu.CompilerParams(
            dimension_semantics=("parallel", "parallel"),
            vmem_limit_bytes=vmem_limit,
        ),
    )(x2d, m)

    if d_pad != d:
        y = y[:, :d]
    return y


# ---------------------------------------------------------------------------
# jitted forwards (mask draw + scale + kernel fused into one dispatch)
# ---------------------------------------------------------------------------
@partial(jax.jit, static_argnames=("p",))
def _fresh_forward(x2d, key, p):
    keep = jax.random.uniform(key, (x2d.shape[-1],), dtype=jnp.float32) >= p
    # p == 1 would give inf*0 = nan; emit zeros instead.
    scale = jnp.float32(0.0) if p >= 1.0 else jnp.float32(1.0 / (1.0 - p))
    mask_scaled = keep.astype(jnp.float32) * scale
    return _apply(x2d, mask_scaled), keep, mask_scaled


@jax.jit
def _frozen_forward(x2d, mask_scaled_f32):
    return _apply(x2d, mask_scaled_f32)


# ---------------------------------------------------------------------------
# Module-equivalent stateful wrapper
# ---------------------------------------------------------------------------
class DropoutCustom:
    """JAX/Pallas port of the PyTorch DropoutCustom module."""

    def __init__(self, p, freeze, seed=0):
        if p < 0 or p > 1:
            raise ValueError("p must be a probability")
        self.p = float(p)
        self.freeze = freeze
        self.drop_mat = None            # boolean keep-mask of shape (D,)
        self._mask_scaled_f32 = None    # cached pre-scaled f32 mask
        self.scale_factor = 0.0 if self.p >= 1.0 else 1.0 / (1.0 - self.p)
        self.training = True
        self._key = jax.random.PRNGKey(seed)  # threaded PRNG state for un-keyed calls

    def __call__(self, x, key=None):
        if not self.training:
            return x
        if x.ndim < 2:
            raise ValueError("DropoutCustom expects at least a 2-D input")
        orig_shape = x.shape
        if x.ndim > 2:
            # Torch draws the mask over x.shape[1] but the multiply broadcasts
            # it against the LAST dim; that only succeeds when they agree.
            if x.shape[1] != x.shape[-1]:
                raise ValueError(
                    "mask of size x.shape[1] cannot broadcast against the last dim"
                )
            x2d = x.reshape(-1, x.shape[-1])
        else:
            x2d = x

        if not self.freeze:
            if key is None:
                self._key, key = jax.random.split(self._key)
            y2d, keep, mask_scaled = _fresh_forward(x2d, key, self.p)
            self.drop_mat = keep
            self._mask_scaled_f32 = mask_scaled
        else:
            if self._mask_scaled_f32 is None:
                raise ValueError("freeze=True requires a prior non-frozen forward")
            y2d = _frozen_forward(x2d, self._mask_scaled_f32)

        return y2d.reshape(orig_shape)


# ---------------------------------------------------------------------------
if __name__ == "__main__":
    root = jax.random.PRNGKey(0)
    kx, kmask, kx2, kmask2 = jax.random.split(root, 4)

    # --- Test 1: (16, 256) f32 — D a multiple of 128 (no-padding path) ------
    batch, features = 16, 256
    x = jax.random.normal(kx, (batch, features), dtype=jnp.float32)
    p = 0.3

    drop = DropoutCustom(p=p, freeze=False)
    y_fresh = jax.block_until_ready(drop(x, key=kmask))   # training, fresh mask

    drop.freeze = True
    y_frozen = jax.block_until_ready(drop(x))              # training, frozen mask

    drop.training = False
    y_eval = jax.block_until_ready(drop(x))                # eval: identity

    mask = drop.drop_mat.astype(jnp.float32)               # (D,) in {0, 1}
    scale = 1.0 / (1.0 - p)
    ref = x * mask[None, :] * scale
    assert jnp.allclose(y_fresh, ref, atol=1e-5), "fresh-mask output mismatch"
    assert jnp.allclose(y_frozen, ref, atol=1e-5), "frozen-mask output mismatch"
    assert jnp.allclose(y_eval, x), "eval mode must be identity"
    assert bool(jnp.all((mask == 0.0) | (mask == 1.0)))

    # --- Test 2: (8, 96) f32 — D not a multiple of 128 (padding path) -------
    x2 = jax.random.normal(kx2, (8, 96), dtype=jnp.float32)
    drop2 = DropoutCustom(p=0.5, freeze=False)
    y2 = jax.block_until_ready(drop2(x2, key=kmask2))
    mask2 = drop2.drop_mat.astype(jnp.float32)
    ref2 = x2 * mask2[None, :] * 2.0
    assert jnp.allclose(y2, ref2, atol=1e-5), "padded-D output mismatch"

    print("KERNEL_OK")
</pallas_src>

<mosaic_0001>
module attributes {stable_mosaic.version = 11 : i64} {
  func.func @_dropout_apply_kernel(%arg0: i32, %arg1: i32, %arg2: memref<8x256xf32, #tpu.memory_space<vmem>>, %arg3: memref<1x256xf32, #tpu.memory_space<vmem>>, %arg4: memref<8x256xf32, #tpu.memory_space<vmem>>) attributes {dimension_semantics = [#tpu.dimension_semantics<parallel>, #tpu.dimension_semantics<parallel>], iteration_bounds = array<i64: 2, 1>, scalar_prefetch = 0 : i64, scratch_operands = 0 : i64, tpu.core_type = #tpu.core_type<tc>, window_params = [{transform_indices = @transform_0, window_bounds = array<i64: 8, 256>}, {transform_indices = @transform_1, window_bounds = array<i64: 1, 256>}, {transform_indices = @transform_2, window_bounds = array<i64: 8, 256>}]} {
    %c0 = arith.constant 0 : index
    %c0_0 = arith.constant 0 : index
    %0 = vector.load %arg2[%c0, %c0_0] : memref<8x256xf32, #tpu.memory_space<vmem>>, vector<8x256xf32>
    %c0_1 = arith.constant 0 : index
    %c0_2 = arith.constant 0 : index
    %1 = vector.load %arg3[%c0_1, %c0_2] : memref<1x256xf32, #tpu.memory_space<vmem>>, vector<1x256xf32>
    %2 = vector.broadcast %1 : vector<1x256xf32> to vector<8x256xf32>
    %3 = arith.mulf %0, %2 : vector<8x256xf32>
    %c0_3 = arith.constant 0 : index
    %c0_4 = arith.constant 0 : index
    %4 = vector.load %arg4[%c0_3, %c0_4] : memref<8x256xf32, #tpu.memory_space<vmem>>, vector<8x256xf32>
    tpu.vector_store %arg4[%c0_3, %c0_4], %3 {strides = array<i32>} : memref<8x256xf32, #tpu.memory_space<vmem>>, vector<8x256xf32>,
    return
  }
  func.func @transform_0(%arg0: i32, %arg1: i32) -> (i32, i32) {
    %c0_i32 = arith.constant 0 : i32
    return %arg0, %arg1 : i32, i32
  }
  func.func @transform_1(%arg0: i32, %arg1: i32) -> (i32, i32) {
    %c0_i32 = arith.constant 0 : i32
    %c0_i32_0 = arith.constant 0 : i32
    return %c0_i32, %arg1 : i32, i32
  }
  func.func @transform_2(%arg0: i32, %arg1: i32) -> (i32, i32) {
    %c0_i32 = arith.constant 0 : i32
    return %arg0, %arg1 : i32, i32
  }
}

</mosaic_0001>

<bundles_post_ra>
// kernel: _fresh_forward.1
= control target key start
LH: loop header
LB: loop body
LE: loop exit
PB: predicated region body
PF: predicated region fallthrough
CT: control target
= control target key end

     0   :  { %7 = vsyncpa [#allocation3], 0  ;;  %s597_s0 = inlined_call_operand.vmem [shape: f32[16,256], index: 0, kind: input, shape index: {}]   ;;  %s598_s1 = inlined_call_operand.vmem [shape: f32[1,256], index: 1, kind: input, shape index: {}]   ;;  %s599_s2 = inlined_call_operand.hbm [shape: f32[16,256], index: 2, kind: output, shape index: {}]  }
   0x1   :  { %9 = vsyncpa [#allocation3 + $0x1], 0  ;;  %s482_s9 = smov 0   ;;  %s484_s10 = smov 0  }
   0x2   :  { %s486_s11 = smov 0   ;;  %s488_s12 = smov 0  }
   0x3   :  { %s490_s13 = smov 0   ;;  %s492_s14 = smov 0  }
   0x4 LB: > { %s315_s15 = sadd.s32 4294967295, %s464_s14   ;;  %s316_s16 = sadd.s32 4294967294, %s464_s14   ;;  %s464_s14 = sphi %s492_s14, %s15_s14   ;;  %s460_s13 = sphi %s490_s13, %s606_s13   ;;  %s456_s12 = sphi %s488_s12, %s605_s12   ;;  %s452_s11 = sphi %s486_s11, %s604_s11   ;;  %s448_s10 = sphi %s484_s10, %s603_s10   ;;  %s444_s9 = sphi %s482_s9, %s602_s9  }
   0x5   : > { %s27_s17 = sadd.s32 1, %s460_s13  ;;  %s90_s18 = sadd.s32 1, %s452_s11 }
   0x6   : > { %p29_p0 = scmp.ge.s32.totalorder %s27_s17, 2  ;;  %p100_p1 = scmp.ne.s32.totalorder %s452_s11, %s448_s10 }
   0x7   : > { %p101_p2 = scmp.eq.s32.totalorder %s315_s15, 1  ;;  %p106_p3 = scmp.ne.s32.totalorder %s448_s10, %s444_s9 }
   0x8   : > { %s608_s17 = smov (%p29_p0, %s27_s17), 0  ;;  %p107_p5 = scmp.eq.s32.totalorder %s316_s16, 1 }
   0x9   : > { %p522_p4 = por %p101_p2, %p100_p1  ;;  %s85_s20 = ssub.s32 %s460_s13, %s608_s17 }
   0xa   : > { %p320_p6 = scmp.ge.s32.totalorder %s464_s14, 1  ;;  %p88_p7 = scmp.eq.s32.totalorder %s85_s20, 0 }
   0xb   : > { %p529_p8 = por %p107_p5, %p106_p3  ;;  %p146_p9 = scmp.lt.s32.totalorder %s464_s14, 3 }
   0xc   : > { %s535_s22 = scalar_select %p88_p7, %s452_s11, %s90_s18  }
   0xd   : > { %p147_p10 = pnand %p320_p6, %p146_p9 }
   0xe   : > { %s173_s23 = sand.u32 (!%p147_p10), 1, %s448_s10   ;;  %p177_p11 = scmp.lt.s32.totalorder (!%p147_p10), %s456_s12, 1  ;;  %v196_v0 = vlaneseq (!%p147_p10)  ;;  %v194_v2 = vld [vmem:[%s598_s1] sm:$0x3] (!%p147_p10) }
   0xf   : > { %150 = sbr.rel (%p147_p10) target bundleno = 43 (0x2b), region = 28  ;;  %s321_s24 = sshll.u32 (!%p147_p10), %s173_s23, 4 }
  0x10   : > { %v197_v1 = vshrl.u32 (!%p147_p10), %v196_v0, 7  ;;  %s330_s28 = sshll.u32 (!%p147_p10), %s456_s12, 8  ;;  %s175_s30 = scalar_lea.vmem (!%p147_p10), [#allocation2], %s321_s24 }
  0x11   : > { %s227_s3 = sshll.u32 (!%p147_p10), %s175_s30, 4  ;;  %s211_s15 = scalar_lea.sflag (!%p147_p10), [#allocation3], %s173_s23  ;;  %s547_s3 = int_to_ptr.vmem [resolvable:$true] %s227_s3 }
  0x12   : > { %v198_v3 = vsub.s32 (!%p147_p10), 0, %v197_v1  ;;  %v202_v4 = vsub.s32 (!%p147_p10), 1, %v197_v1  ;;  %s386_s16 = scalar_lea.vmem (!%p147_p10), %s547_s3, 256  ;;  %s466_s18 = smov (!%p147_p10), [#allocation2]  }
  0x13   : > { %p387_p12 = scmp.ne.s32.totalorder (!%p147_p10), %s547_s3, %s386_s16  ;;  %s390_s20 = sshll.u32 (!%p147_p10), %s466_s18, 4  ;;  %s391_s20 = int_to_ptr.vmem [resolvable:$false] %s390_s20 }
  0x14   : > { %v199_v5 = vrot.slane (!%p147_p10), %v194_v2, %v198_v3  ;;  %v203_v6 = vrot.slane (!%p147_p10), %v194_v2, %v202_v4  ;;  %s392_s24 = scalar_lea.vmem (!%p147_p10), %s391_s20, 512  ;;  %p393_p1 = scmp.lt.s32.totalorder (!%p147_p10), %s547_s3, %s391_s20 }
  0x15   : > { %p388_p13 = pnand (!%p147_p10), %p387_p12, %p522_p4  ;;  %p394_p2 = scmp.lt.s32.totalorder (!%p147_p10), %s392_s24, %s386_s16 }
  0x16   : > { %s178_s25 = scalar_select %p177_p11, %s456_s12, 1 }
  0x17   : > { %s552_s12 = scalar_lea.hbm %s599_s2, %s330_s28  ;;  %p389_p0 = pneg %p388_p13 }
  0x18   : > { %s329_s29 = sshll.u32 %s178_s25, 4  ;;  %p395_p3 = por %p394_p2, %p393_p1 }
  0x19   : > { %s184_s6 = scalar_lea.vmem %s597_s0, %s329_s29 }
  0x1a   : > { %v192_v7 = vld [vmem:[%s184_s6] sm:$0xff]  ;;  %v193_v8 = vld [vmem:[%s184_s6 + $0x8] sm:$0xff]  ;;  %p396_p5 = pnand %p395_p3, %p389_p0 }
  0x1b   : > { %v206_v9 = vmul.f32 %v199_v5, %v192_v7  ;;  %v207_v10 = vmul.f32 %v203_v6, %v193_v8 }
  0x1d   : > { %208 = vst [vmem:[%s175_s30] sm:$0xff] %v206_v9  ;;  %209 = vst [vmem:[%s175_s30 + $0x8] sm:$0xff] %v207_v10 }
  0x1e   : > { %399 = shalt.err (!%p396_p5)
}
  0x1f   : > { %s400_s23 = scalar_lea.hbm %s552_s12, 256  ;;  %s404_s27 = scalar_lea.hbm %s599_s2, 512 }
  0x20   : > { %p401_p6 = scmp.ne.s32.totalorder %s552_s12, %s400_s23  ;;  %p405_p10 = scmp.lt.u32.totalorder %s552_s12, %s599_s2 }
  0x21   : > { %p406_p11 = scmp.lt.u32.totalorder %s404_s27, %s400_s23  ;;  %p408_p13 = scmp.lt.u32.totalorder %s400_s23, %s552_s12 }
  0x22   : > { %p402_p7 = pnand %p401_p6, %p522_p4 }
  0x23   : > { %p407_p12 = por %p406_p11, %p405_p10 }
  0x24   : > { %p403_p9 = pneg %p402_p7 }
  0x25   : > { %p409_p0 = por %p408_p13, %p407_p12 }
  0x27   : > { %p410_p1 = pnand %p409_p0, %p403_p9 }
  0x29   : > { %413 = shalt.err (!%p410_p1)
}
  0x2a   : > { %331 = dma.vmem_to_hbm [thread:$0]  (%p522_p4), %s547_s3, 256, %s552_s12, %s211_s15  }
  0x2b PF: > { %p337_p2 = scmp.ge.s32.totalorder %s464_s14, 2  ;;  %s239_s30 = sand.u32 1, %s444_s9  }
  0x2c   : > { %s240_s4 = scalar_lea.sflag [#allocation3], %s239_s30 }
  0x2d   : > { %p334_p3 = pnand %p337_p2, %p529_p8 }
  0x2f   : > { %439 = dma.done.wait (!%p334_p3), %s240_s4, 256  }
  0x30   : > { %441 = vsyncadd (!%p334_p3), %s240_s4, 4294967040  ;;  %s15_s14 = sadd.s32 1, %s464_s14   ;;  %s602_s9 = smov %s448_s10 }
  0x31   : > { %p12_p5 = scmp.ge.s32.totalorder %s15_s14, 4   ;;  %s603_s10 = smov %s452_s11 }
  0x32   : > { %s604_s11 = smov %s535_s22  ;;  %s605_s12 = smov %s460_s13 }
  0x33   : > { %s606_s13 = smov %s608_s17  ;;  %14 = sbr.rel (!%p12_p5) target bundleno = 4 (0x4), region = 66 }
  0x3a   :  { %245 = vsyncpa [#allocation3], 1 }
  0x3b   :  { %247 = vsyncpa [#allocation3 + $0x1], 1 }

</bundles_post_ra>
